<compile_context>
chip_gen: v6e
topology: v6e:2x2x1
jax: 0.10.0
libtpu: 0.0.40
codegen_flags: <defaults>
</compile_context>

<pallas_src>
import math
from functools import partial

import jax
import jax.numpy as jnp
from jax import lax
from jax.experimental import pallas as pl
from jax.experimental.pallas import tpu as pltpu

NEG_SLOPE = 0.01   # nn.LeakyReLU default
BN_EPS = 1e-4      # BatchNorm2d(eps=0.0001)


# ---------------------------------------------------------------------------
# Fused kernel: QKV projections + channel attention + block transpose +
# conv_out.  One grid step per batch element.
# ---------------------------------------------------------------------------
def _cross_attention_kernel(q_ref, v_ref, wqv_ref, bqv_ref, wk_ref, bk_ref,
                            bns_ref, bnt_ref, w1_ref, b1_ref, w2_ref, b2_ref,
                            out_ref, xd_s, *, cq, cq_pad, m, inv_scale):
    f32 = jnp.float32
    bf16 = jnp.bfloat16

    # f32 HBM blocks -> bf16 in VMEM for the MXU (cast is free VPU filler).
    q = q_ref[0].astype(bf16)          # (Cq, N)
    vv = v_ref[0].astype(bf16)         # (Ck, N)

    # --- 1x1-conv projections == channel matmuls.  Q and V projections share
    # the input q, so their weights are stacked into a single MXU push. ---
    qv = jnp.dot(wqv_ref[...], q, preferred_element_type=f32) + bqv_ref[...]
    key = jnp.dot(wk_ref[...], vv, preferred_element_type=f32) + bk_ref[...]
    query = qv[:cq, :]         # (Cq, N)  slice at sublane offset 0
    value = qv[cq_pad:, :]     # (Ck, N)  slice at 8-aligned sublane offset

    # --- channel attention: temp[c, k] = sum_n query[c, n] * key[k, n] ---
    temp = lax.dot_general(query, key, (((1,), (1,)), ((), ())),
                           preferred_element_type=f32) * inv_scale   # (Cq, Ck)
    mx = jnp.max(temp, axis=-1, keepdims=True)
    e = jnp.exp(temp - mx)
    den = jnp.sum(e, axis=-1, keepdims=True)
    p = e * pl.reciprocal(den, approx=True)                          # softmax

    attn = jnp.dot(p.astype(bf16), value.astype(bf16),
                   preferred_element_type=f32)                       # (Cq, N)

    # --- block-transpose half of the permute(0,2,1)+view glue, written
    # straight from the attn VALUE into scratch (no attn_s round trip).  The
    # remaining fixed lane permutation commutes with the per-column conv_out
    # ops and is applied as a cheap reshape/transpose in the wrapper — no
    # N x N permutation matrix anywhere. ---
    for d in range(cq):
        for c in range(cq):
            xd_s[pl.ds(d, 1), pl.ds(c * m, m)] = attn[c:c + 1, d * m:(d + 1) * m]
    x = xd_s[...]                                                    # (Cq, N)

    # --- conv_out: BN (folded scale/shift) -> LReLU -> conv -> LReLU -> conv
    xn = x * bns_ref[...] + bnt_ref[...]
    xn = jnp.where(xn > 0, xn, NEG_SLOPE * xn)
    h = jnp.dot(w1_ref[...], xn.astype(bf16),
                preferred_element_type=f32) + b1_ref[...]
    h = jnp.where(h > 0, h, NEG_SLOPE * h)
    out_ref[0] = jnp.dot(w2_ref[...], h.astype(bf16),
                         preferred_element_type=f32) + b2_ref[...]


# ---------------------------------------------------------------------------
# One-time parameter preparation (hoisted out of the forward path).
# ---------------------------------------------------------------------------
def prepare_cross_attention_params(params):
    f32 = jnp.float32
    bf16 = jnp.bfloat16
    Cq = params["wq"].shape[0]
    Ck = params["wk"].shape[0]
    Cq_pad = ((Cq + 7) // 8) * 8   # 8-row alignment -> tile-aligned value slice

    # Stacked Q/V projection weights (both consume q); zero rows pad Cq to 8.
    w_qv = jnp.zeros((Cq_pad + Ck, Cq), f32)
    w_qv = w_qv.at[:Cq].set(params["wq"]).at[Cq_pad:].set(params["wv"]).astype(bf16)
    b_qv = jnp.zeros((Cq_pad + Ck, 1), f32)
    b_qv = b_qv.at[:Cq].set(params["bq"]).at[Cq_pad:].set(params["bv"])

    # Fold BatchNorm (inference) into a single scale/shift.
    bn_scale = params["bn_gamma"] * lax.rsqrt(params["bn_var"] + BN_EPS)
    bn_shift = params["bn_beta"] - params["bn_mean"] * bn_scale

    return {
        "w_qv": w_qv, "b_qv": b_qv,
        "wk": params["wk"].astype(bf16), "bk": params["bk"],
        "bn_scale": bn_scale, "bn_shift": bn_shift,
        "w1": params["w1"].astype(bf16), "b1": params["b1"],
        "w2": params["w2"].astype(bf16), "b2": params["b2"],
    }


# ---------------------------------------------------------------------------
# Wrapper
# ---------------------------------------------------------------------------
def cross_attention_forward(q, v, prep):
    B, Cq, H, W = q.shape
    _, Ck, Hv, Wv = v.shape
    N = H * W
    assert Hv * Wv == N, "attention bmm requires equal flattened spatial size"
    # TODO(synk): general H*W % Cq != 0 path for the permute+view glue.
    assert N % Cq == 0
    M = N // Cq
    Cq_pad = ((Cq + 7) // 8) * 8

    f32 = jnp.float32
    qf = q.reshape(B, Cq, N)        # stays f32; cast to bf16 inside the kernel
    vf = v.reshape(B, Ck, N)

    def full_spec(shape):
        return pl.BlockSpec(shape, lambda b: (0,) * len(shape))

    kernel = partial(_cross_attention_kernel, cq=Cq, cq_pad=Cq_pad, m=M,
                     inv_scale=1.0 / math.sqrt(N))

    cost = pl.CostEstimate(
        flops=int(2 * B * N * ((Cq_pad + Ck) * Cq + Ck * Ck
                               + 2 * Cq * Ck + 2 * Cq * Cq)),
        transcendentals=int(B * Cq * (Ck + 1)),
        bytes_accessed=int(4 * B * N * (2 * Cq + Ck)),
    )

    yd = pl.pallas_call(
        kernel,
        out_shape=jax.ShapeDtypeStruct((B, Cq, N), f32),
        grid_spec=pltpu.PrefetchScalarGridSpec(
            num_scalar_prefetch=0,
            grid=(B,),
            in_specs=[
                pl.BlockSpec((1, Cq, N), lambda b: (b, 0, 0)),   # q_flat (f32)
                pl.BlockSpec((1, Ck, N), lambda b: (b, 0, 0)),   # v_flat (f32)
                full_spec((Cq_pad + Ck, Cq)),                    # stacked Wq/Wv
                full_spec((Cq_pad + Ck, 1)),                     # stacked bq/bv
                full_spec((Ck, Ck)),                             # Wk
                full_spec((Ck, 1)),                              # bk
                full_spec((Cq, 1)),                              # BN scale
                full_spec((Cq, 1)),                              # BN shift
                full_spec((Cq, Cq)),                             # W1
                full_spec((Cq, 1)),                              # b1
                full_spec((Cq, Cq)),                             # W2
                full_spec((Cq, 1)),                              # b2
            ],
            out_specs=pl.BlockSpec((1, Cq, N), lambda b: (b, 0, 0)),
            scratch_shapes=[pltpu.VMEM((Cq, N), f32)],           # de-interleaved
        ),
        compiler_params=pltpu.CompilerParams(
            dimension_semantics=("parallel",),        # B>=2 -> both v7x TCs busy
            vmem_limit_bytes=32 * 1024 * 1024,
        ),
        cost_estimate=cost,
    )(qf, vf, prep["w_qv"], prep["b_qv"], prep["wk"], prep["bk"],
      prep["bn_scale"], prep["bn_shift"],
      prep["w1"], prep["b1"], prep["w2"], prep["b2"])

    # Final lane permutation (column c*M+m -> m*Cq+c): pure layout, commutes
    # with conv_out, done as a cheap XLA reshape/transpose on the output.
    out = jnp.transpose(yd.reshape(B, Cq, Cq, M), (0, 1, 3, 2))
    return out.reshape(B, Cq, H, W)


# ---------------------------------------------------------------------------
# Pure-JAX f32 reference (same math as the PyTorch module, eval-mode BN)
# ---------------------------------------------------------------------------
def cross_attention_reference(q, v, params):
    B, Cq, H, W = q.shape
    Ck = v.shape[1]
    N = H * W
    qf = q.reshape(B, Cq, N)
    vf = v.reshape(B, Ck, N)
    query = jnp.einsum("oc,bcn->bon", params["wq"], qf) + params["bq"][None]
    key = jnp.einsum("oc,bcn->bon", params["wk"], vf) + params["bk"][None]
    value = jnp.einsum("oc,bcn->bon", params["wv"], qf) + params["bv"][None]
    temp = jnp.einsum("bqn,bkn->bqk", query, key) / math.sqrt(N)
    p = jax.nn.softmax(temp, axis=-1)
    attn = jnp.einsum("bqk,bkn->bqn", p, value)
    x = jnp.transpose(attn, (0, 2, 1)).reshape(B, Cq, N)     # permute+view glue
    scale = params["bn_gamma"] * lax.rsqrt(params["bn_var"] + BN_EPS)
    shift = params["bn_beta"] - params["bn_mean"] * scale
    y = x * scale[None] + shift[None]
    y = jnp.where(y > 0, y, NEG_SLOPE * y)
    y = jnp.einsum("oc,bcn->bon", params["w1"], y) + params["b1"][None]
    y = jnp.where(y > 0, y, NEG_SLOPE * y)
    y = jnp.einsum("oc,bcn->bon", params["w2"], y) + params["b2"][None]
    return y.reshape(B, Cq, H, W)


def init_params(key, qv_in_channels, k_in_channels):
    Cq, Ck = qv_in_channels, k_in_channels
    ks = jax.random.split(key, 5)
    scale = 0.1
    return {
        # 1x1 conv weights stored as (C_out, C_in); biases as (C_out, 1)
        "wq": jax.random.normal(ks[0], (Cq, Cq), jnp.float32) * scale,
        "bq": jnp.zeros((Cq, 1), jnp.float32),
        "wk": jax.random.normal(ks[1], (Ck, Ck), jnp.float32) * scale,
        "bk": jnp.zeros((Ck, 1), jnp.float32),
        "wv": jax.random.normal(ks[2], (Ck, Cq), jnp.float32) * scale,
        "bv": jnp.zeros((Ck, 1), jnp.float32),
        # BatchNorm2d defaults (inference mode)
        "bn_gamma": jnp.ones((Cq, 1), jnp.float32),
        "bn_beta": jnp.zeros((Cq, 1), jnp.float32),
        "bn_mean": jnp.zeros((Cq, 1), jnp.float32),
        "bn_var": jnp.ones((Cq, 1), jnp.float32),
        # conv_out 1x1 convs
        "w1": jax.random.normal(ks[3], (Cq, Cq), jnp.float32) * scale,
        "b1": jnp.zeros((Cq, 1), jnp.float32),
        "w2": jax.random.normal(ks[4], (Cq, Cq), jnp.float32) * scale,
        "b2": jnp.zeros((Cq, 1), jnp.float32),
    }


if __name__ == "__main__":
    B, Cq, Ck, H, W = 2, 4, 8, 16, 16   # q: (B, Cq, H, W), v: (B, Ck, H, W)
    key = jax.random.PRNGKey(0)
    kq, kv, kp = jax.random.split(key, 3)

    q = jax.random.normal(kq, (B, Cq, H, W), jnp.float32)
    v = jax.random.normal(kv, (B, Ck, H, W), jnp.float32)
    params = init_params(kp, Cq, Ck)

    # One-time parameter prep (weight stacking / BN fold) — hoisted out of the
    # per-call forward path.
    prep = jax.tree_util.tree_map(jax.block_until_ready,
                                  prepare_cross_attention_params(params))

    fwd = jax.jit(cross_attention_forward)
    out = fwd(q, v, prep)
    jax.block_until_ready(out)
    assert out.shape == (B, Cq, H, W)

    ref = cross_attention_reference(q, v, params)
    err = float(jnp.max(jnp.abs(out - ref)))
    assert err < 2e-2, f"max abs error vs f32 reference too large: {err}"

    print("KERNEL_OK")
</pallas_src>

<mosaic_0001>
module attributes {stable_mosaic.version = 11 : i64} {
  func.func @_cross_attention_kernel(%arg0: i32, %arg1: memref<1x4x256xf32, #tpu.memory_space<vmem>>, %arg2: memref<1x8x256xf32, #tpu.memory_space<vmem>>, %arg3: memref<16x4xbf16, #tpu.memory_space<vmem>>, %arg4: memref<16x1xf32, #tpu.memory_space<vmem>>, %arg5: memref<8x8xbf16, #tpu.memory_space<vmem>>, %arg6: memref<8x1xf32, #tpu.memory_space<vmem>>, %arg7: memref<4x1xf32, #tpu.memory_space<vmem>>, %arg8: memref<4x1xf32, #tpu.memory_space<vmem>>, %arg9: memref<4x4xbf16, #tpu.memory_space<vmem>>, %arg10: memref<4x1xf32, #tpu.memory_space<vmem>>, %arg11: memref<4x4xbf16, #tpu.memory_space<vmem>>, %arg12: memref<4x1xf32, #tpu.memory_space<vmem>>, %arg13: memref<1x4x256xf32, #tpu.memory_space<vmem>>, %arg14: memref<4x256xf32, #tpu.memory_space<vmem>>) attributes {dimension_semantics = [#tpu.dimension_semantics<parallel>], iteration_bounds = array<i64: 2>, scalar_prefetch = 0 : i64, scratch_operands = 1 : i64, tpu.core_type = #tpu.core_type<tc>, window_params = [{transform_indices = @transform_0, window_bounds = array<i64: 1, 4, 256>}, {transform_indices = @transform_1, window_bounds = array<i64: 1, 8, 256>}, {pipeline_mode = #tpu.pipeline_mode<synchronous>, transform_indices = @transform_2, window_bounds = array<i64: 16, 4>}, {pipeline_mode = #tpu.pipeline_mode<synchronous>, transform_indices = @transform_3, window_bounds = array<i64: 16, 1>}, {pipeline_mode = #tpu.pipeline_mode<synchronous>, transform_indices = @transform_4, window_bounds = array<i64: 8, 8>}, {pipeline_mode = #tpu.pipeline_mode<synchronous>, transform_indices = @transform_5, window_bounds = array<i64: 8, 1>}, {pipeline_mode = #tpu.pipeline_mode<synchronous>, transform_indices = @transform_6, window_bounds = array<i64: 4, 1>}, {pipeline_mode = #tpu.pipeline_mode<synchronous>, transform_indices = @transform_7, window_bounds = array<i64: 4, 1>}, {pipeline_mode = #tpu.pipeline_mode<synchronous>, transform_indices = @transform_8, window_bounds = array<i64: 4, 4>}, {pipeline_mode = #tpu.pipeline_mode<synchronous>, transform_indices = @transform_9, window_bounds = array<i64: 4, 1>}, {pipeline_mode = #tpu.pipeline_mode<synchronous>, transform_indices = @transform_10, window_bounds = array<i64: 4, 4>}, {pipeline_mode = #tpu.pipeline_mode<synchronous>, transform_indices = @transform_11, window_bounds = array<i64: 4, 1>}, {transform_indices = @transform_12, window_bounds = array<i64: 1, 4, 256>}]} {
    %c0 = arith.constant 0 : index
    %c0_0 = arith.constant 0 : index
    %c0_1 = arith.constant 0 : index
    %0 = vector.load %arg1[%c0, %c0_0, %c0_1] : memref<1x4x256xf32, #tpu.memory_space<vmem>>, vector<1x4x256xf32>
    %1 = vector.shape_cast %0 : vector<1x4x256xf32> to vector<4x256xf32>
    %2 = arith.truncf %1 : vector<4x256xf32> to vector<4x256xbf16>
    %c0_2 = arith.constant 0 : index
    %c0_3 = arith.constant 0 : index
    %c0_4 = arith.constant 0 : index
    %3 = vector.load %arg2[%c0_2, %c0_3, %c0_4] : memref<1x8x256xf32, #tpu.memory_space<vmem>>, vector<1x8x256xf32>
    %4 = vector.shape_cast %3 : vector<1x8x256xf32> to vector<8x256xf32>
    %5 = arith.truncf %4 : vector<8x256xf32> to vector<8x256xbf16>
    %c0_5 = arith.constant 0 : index
    %c0_6 = arith.constant 0 : index
    %6 = vector.load %arg3[%c0_5, %c0_6] : memref<16x4xbf16, #tpu.memory_space<vmem>>, vector<16x4xbf16>
    %cst = arith.constant dense<0.000000e+00> : vector<16x256xf32>
    %7 = tpu.matmul %6, %2, %cst {dimension_numbers = #tpu.dot_dimension_numbers<[1], [0], [0], [1], [0, 0, 1, 1], [], []>} : vector<16x4xbf16>, vector<4x256xbf16>, vector<16x256xf32> -> vector<16x256xf32>
    %c0_7 = arith.constant 0 : index
    %c0_8 = arith.constant 0 : index
    %8 = vector.load %arg4[%c0_7, %c0_8] : memref<16x1xf32, #tpu.memory_space<vmem>>, vector<16x1xf32>
    %9 = vector.broadcast %8 : vector<16x1xf32> to vector<16x256xf32>
    %10 = arith.addf %7, %9 : vector<16x256xf32>
    %c0_9 = arith.constant 0 : index
    %c0_10 = arith.constant 0 : index
    %11 = vector.load %arg5[%c0_9, %c0_10] : memref<8x8xbf16, #tpu.memory_space<vmem>>, vector<8x8xbf16>
    %cst_11 = arith.constant dense<0.000000e+00> : vector<8x256xf32>
    %12 = tpu.matmul %11, %5, %cst_11 {dimension_numbers = #tpu.dot_dimension_numbers<[1], [0], [0], [1], [0, 0, 1, 1], [], []>} : vector<8x8xbf16>, vector<8x256xbf16>, vector<8x256xf32> -> vector<8x256xf32>
    %c0_12 = arith.constant 0 : index
    %c0_13 = arith.constant 0 : index
    %13 = vector.load %arg6[%c0_12, %c0_13] : memref<8x1xf32, #tpu.memory_space<vmem>>, vector<8x1xf32>
    %14 = vector.broadcast %13 : vector<8x1xf32> to vector<8x256xf32>
    %15 = arith.addf %12, %14 : vector<8x256xf32>
    %16 = vector.extract_strided_slice %10 {offsets = [0, 0], sizes = [4, 256], strides = [1, 1]} : vector<16x256xf32> to vector<4x256xf32>
    %17 = vector.extract_strided_slice %10 {offsets = [8, 0], sizes = [8, 256], strides = [1, 1]} : vector<16x256xf32> to vector<8x256xf32>
    %cst_14 = arith.constant dense<0.000000e+00> : vector<4x8xf32>
    %18 = tpu.matmul %16, %15, %cst_14 {dimension_numbers = #tpu.dot_dimension_numbers<[1], [1], [0], [0], [0, 0, 1, 0], [], []>} : vector<4x256xf32>, vector<8x256xf32>, vector<4x8xf32> -> vector<4x8xf32>
    %cst_15 = arith.constant 6.250000e-02 : f32
    %19 = vector.broadcast %cst_15 : f32 to vector<4x8xf32>
    %20 = arith.mulf %18, %19 : vector<4x8xf32>
    %cst_16 = arith.constant dense<0xFF800000> : vector<4xf32>
    %21 = vector.multi_reduction <maximumf>, %20, %cst_16 [1] : vector<4x8xf32> to vector<4xf32>
    %22 = vector.shape_cast %21 : vector<4xf32> to vector<4x1xf32>
    %23 = vector.broadcast %22 : vector<4x1xf32> to vector<4x8xf32>
    %24 = arith.subf %20, %23 : vector<4x8xf32>
    %25 = math.exp %24 : vector<4x8xf32>
    %cst_17 = arith.constant dense<0.000000e+00> : vector<4xf32>
    %26 = vector.multi_reduction <add>, %25, %cst_17 [1] : vector<4x8xf32> to vector<4xf32>
    %27 = vector.shape_cast %26 : vector<4xf32> to vector<4x1xf32>
    %28 = tpu.reciprocal %27 {approx = true} : vector<4x1xf32> -> vector<4x1xf32>
    %29 = vector.broadcast %28 : vector<4x1xf32> to vector<4x8xf32>
    %30 = arith.mulf %25, %29 : vector<4x8xf32>
    %31 = arith.truncf %30 : vector<4x8xf32> to vector<4x8xbf16>
    %32 = arith.truncf %17 : vector<8x256xf32> to vector<8x256xbf16>
    %cst_18 = arith.constant dense<0.000000e+00> : vector<4x256xf32>
    %33 = tpu.matmul %31, %32, %cst_18 {dimension_numbers = #tpu.dot_dimension_numbers<[1], [0], [0], [1], [0, 0, 1, 1], [], []>} : vector<4x8xbf16>, vector<8x256xbf16>, vector<4x256xf32> -> vector<4x256xf32>
    %34 = vector.extract_strided_slice %33 {offsets = [0, 0], sizes = [1, 64], strides = [1, 1]} : vector<4x256xf32> to vector<1x64xf32>
    %c0_19 = arith.constant 0 : index
    %c0_20 = arith.constant 0 : index
    %35 = vector.load %arg14[%c0_19, %c0_20] : memref<4x256xf32, #tpu.memory_space<vmem>>, vector<1x64xf32>
    tpu.vector_store %arg14[%c0_19, %c0_20], %34 {strides = array<i32>} : memref<4x256xf32, #tpu.memory_space<vmem>>, vector<1x64xf32>,
    %36 = vector.extract_strided_slice %33 {offsets = [1, 0], sizes = [1, 64], strides = [1, 1]} : vector<4x256xf32> to vector<1x64xf32>
    %c0_21 = arith.constant 0 : index
    %c64 = arith.constant 64 : index
    %37 = vector.load %arg14[%c0_21, %c64] : memref<4x256xf32, #tpu.memory_space<vmem>>, vector<1x64xf32>
    tpu.vector_store %arg14[%c0_21, %c64], %36 {strides = array<i32>} : memref<4x256xf32, #tpu.memory_space<vmem>>, vector<1x64xf32>,
    %38 = vector.extract_strided_slice %33 {offsets = [2, 0], sizes = [1, 64], strides = [1, 1]} : vector<4x256xf32> to vector<1x64xf32>
    %c0_22 = arith.constant 0 : index
    %c128 = arith.constant 128 : index
    %39 = vector.load %arg14[%c0_22, %c128] : memref<4x256xf32, #tpu.memory_space<vmem>>, vector<1x64xf32>
    tpu.vector_store %arg14[%c0_22, %c128], %38 {strides = array<i32>} : memref<4x256xf32, #tpu.memory_space<vmem>>, vector<1x64xf32>,
    %40 = vector.extract_strided_slice %33 {offsets = [3, 0], sizes = [1, 64], strides = [1, 1]} : vector<4x256xf32> to vector<1x64xf32>
    %c0_23 = arith.constant 0 : index
    %c192 = arith.constant 192 : index
    %41 = vector.load %arg14[%c0_23, %c192] : memref<4x256xf32, #tpu.memory_space<vmem>>, vector<1x64xf32>
    tpu.vector_store %arg14[%c0_23, %c192], %40 {strides = array<i32>} : memref<4x256xf32, #tpu.memory_space<vmem>>, vector<1x64xf32>,
    %42 = vector.extract_strided_slice %33 {offsets = [0, 64], sizes = [1, 64], strides = [1, 1]} : vector<4x256xf32> to vector<1x64xf32>
    %c1 = arith.constant 1 : index
    %c0_24 = arith.constant 0 : index
    %43 = vector.load %arg14[%c1, %c0_24] : memref<4x256xf32, #tpu.memory_space<vmem>>, vector<1x64xf32>
    tpu.vector_store %arg14[%c1, %c0_24], %42 {strides = array<i32>} : memref<4x256xf32, #tpu.memory_space<vmem>>, vector<1x64xf32>,
    %44 = vector.extract_strided_slice %33 {offsets = [1, 64], sizes = [1, 64], strides = [1, 1]} : vector<4x256xf32> to vector<1x64xf32>
    %c1_25 = arith.constant 1 : index
    %c64_26 = arith.constant 64 : index
    %45 = vector.load %arg14[%c1_25, %c64_26] : memref<4x256xf32, #tpu.memory_space<vmem>>, vector<1x64xf32>
    tpu.vector_store %arg14[%c1_25, %c64_26], %44 {strides = array<i32>} : memref<4x256xf32, #tpu.memory_space<vmem>>, vector<1x64xf32>,
    %46 = vector.extract_strided_slice %33 {offsets = [2, 64], sizes = [1, 64], strides = [1, 1]} : vector<4x256xf32> to vector<1x64xf32>
    %c1_27 = arith.constant 1 : index
    %c128_28 = arith.constant 128 : index
    %47 = vector.load %arg14[%c1_27, %c128_28] : memref<4x256xf32, #tpu.memory_space<vmem>>, vector<1x64xf32>
    tpu.vector_store %arg14[%c1_27, %c128_28], %46 {strides = array<i32>} : memref<4x256xf32, #tpu.memory_space<vmem>>, vector<1x64xf32>,
    %48 = vector.extract_strided_slice %33 {offsets = [3, 64], sizes = [1, 64], strides = [1, 1]} : vector<4x256xf32> to vector<1x64xf32>
    %c1_29 = arith.constant 1 : index
    %c192_30 = arith.constant 192 : index
    %49 = vector.load %arg14[%c1_29, %c192_30] : memref<4x256xf32, #tpu.memory_space<vmem>>, vector<1x64xf32>
    tpu.vector_store %arg14[%c1_29, %c192_30], %48 {strides = array<i32>} : memref<4x256xf32, #tpu.memory_space<vmem>>, vector<1x64xf32>,
    %50 = vector.extract_strided_slice %33 {offsets = [0, 128], sizes = [1, 64], strides = [1, 1]} : vector<4x256xf32> to vector<1x64xf32>
    %c2 = arith.constant 2 : index
    %c0_31 = arith.constant 0 : index
    %51 = vector.load %arg14[%c2, %c0_31] : memref<4x256xf32, #tpu.memory_space<vmem>>, vector<1x64xf32>
    tpu.vector_store %arg14[%c2, %c0_31], %50 {strides = array<i32>} : memref<4x256xf32, #tpu.memory_space<vmem>>, vector<1x64xf32>,
    %52 = vector.extract_strided_slice %33 {offsets = [1, 128], sizes = [1, 64], strides = [1, 1]} : vector<4x256xf32> to vector<1x64xf32>
    %c2_32 = arith.constant 2 : index
    %c64_33 = arith.constant 64 : index
    %53 = vector.load %arg14[%c2_32, %c64_33] : memref<4x256xf32, #tpu.memory_space<vmem>>, vector<1x64xf32>
    tpu.vector_store %arg14[%c2_32, %c64_33], %52 {strides = array<i32>} : memref<4x256xf32, #tpu.memory_space<vmem>>, vector<1x64xf32>,
    %54 = vector.extract_strided_slice %33 {offsets = [2, 128], sizes = [1, 64], strides = [1, 1]} : vector<4x256xf32> to vector<1x64xf32>
    %c2_34 = arith.constant 2 : index
    %c128_35 = arith.constant 128 : index
    %55 = vector.load %arg14[%c2_34, %c128_35] : memref<4x256xf32, #tpu.memory_space<vmem>>, vector<1x64xf32>
    tpu.vector_store %arg14[%c2_34, %c128_35], %54 {strides = array<i32>} : memref<4x256xf32, #tpu.memory_space<vmem>>, vector<1x64xf32>,
    %56 = vector.extract_strided_slice %33 {offsets = [3, 128], sizes = [1, 64], strides = [1, 1]} : vector<4x256xf32> to vector<1x64xf32>
    %c2_36 = arith.constant 2 : index
    %c192_37 = arith.constant 192 : index
    %57 = vector.load %arg14[%c2_36, %c192_37] : memref<4x256xf32, #tpu.memory_space<vmem>>, vector<1x64xf32>
    tpu.vector_store %arg14[%c2_36, %c192_37], %56 {strides = array<i32>} : memref<4x256xf32, #tpu.memory_space<vmem>>, vector<1x64xf32>,
    %58 = vector.extract_strided_slice %33 {offsets = [0, 192], sizes = [1, 64], strides = [1, 1]} : vector<4x256xf32> to vector<1x64xf32>
    %c3 = arith.constant 3 : index
    %c0_38 = arith.constant 0 : index
    %59 = vector.load %arg14[%c3, %c0_38] : memref<4x256xf32, #tpu.memory_space<vmem>>, vector<1x64xf32>
    tpu.vector_store %arg14[%c3, %c0_38], %58 {strides = array<i32>} : memref<4x256xf32, #tpu.memory_space<vmem>>, vector<1x64xf32>,
    %60 = vector.extract_strided_slice %33 {offsets = [1, 192], sizes = [1, 64], strides = [1, 1]} : vector<4x256xf32> to vector<1x64xf32>
    %c3_39 = arith.constant 3 : index
    %c64_40 = arith.constant 64 : index
    %61 = vector.load %arg14[%c3_39, %c64_40] : memref<4x256xf32, #tpu.memory_space<vmem>>, vector<1x64xf32>
    tpu.vector_store %arg14[%c3_39, %c64_40], %60 {strides = array<i32>} : memref<4x256xf32, #tpu.memory_space<vmem>>, vector<1x64xf32>,
    %62 = vector.extract_strided_slice %33 {offsets = [2, 192], sizes = [1, 64], strides = [1, 1]} : vector<4x256xf32> to vector<1x64xf32>
    %c3_41 = arith.constant 3 : index
    %c128_42 = arith.constant 128 : index
    %63 = vector.load %arg14[%c3_41, %c128_42] : memref<4x256xf32, #tpu.memory_space<vmem>>, vector<1x64xf32>
    tpu.vector_store %arg14[%c3_41, %c128_42], %62 {strides = array<i32>} : memref<4x256xf32, #tpu.memory_space<vmem>>, vector<1x64xf32>,
    %64 = vector.extract_strided_slice %33 {offsets = [3, 192], sizes = [1, 64], strides = [1, 1]} : vector<4x256xf32> to vector<1x64xf32>
    %c3_43 = arith.constant 3 : index
    %c192_44 = arith.constant 192 : index
    %65 = vector.load %arg14[%c3_43, %c192_44] : memref<4x256xf32, #tpu.memory_space<vmem>>, vector<1x64xf32>
    tpu.vector_store %arg14[%c3_43, %c192_44], %64 {strides = array<i32>} : memref<4x256xf32, #tpu.memory_space<vmem>>, vector<1x64xf32>,
    %c0_45 = arith.constant 0 : index
    %c0_46 = arith.constant 0 : index
    %66 = vector.load %arg14[%c0_45, %c0_46] : memref<4x256xf32, #tpu.memory_space<vmem>>, vector<4x256xf32>
    %c0_47 = arith.constant 0 : index
    %c0_48 = arith.constant 0 : index
    %67 = vector.load %arg7[%c0_47, %c0_48] : memref<4x1xf32, #tpu.memory_space<vmem>>, vector<4x1xf32>
    %68 = vector.broadcast %67 : vector<4x1xf32> to vector<4x256xf32>
    %69 = arith.mulf %66, %68 : vector<4x256xf32>
    %c0_49 = arith.constant 0 : index
    %c0_50 = arith.constant 0 : index
    %70 = vector.load %arg8[%c0_49, %c0_50] : memref<4x1xf32, #tpu.memory_space<vmem>>, vector<4x1xf32>
    %71 = vector.broadcast %70 : vector<4x1xf32> to vector<4x256xf32>
    %72 = arith.addf %69, %71 : vector<4x256xf32>
    %cst_51 = arith.constant 0.000000e+00 : f32
    %73 = vector.broadcast %cst_51 : f32 to vector<4x256xf32>
    %74 = arith.cmpf ogt, %72, %73 : vector<4x256xf32>
    %cst_52 = arith.constant 0.00999999977 : f32
    %75 = vector.broadcast %cst_52 : f32 to vector<4x256xf32>
    %76 = arith.mulf %75, %72 : vector<4x256xf32>
    %77 = arith.select %74, %72, %76 : vector<4x256xi1>, vector<4x256xf32>
    %c0_53 = arith.constant 0 : index
    %c0_54 = arith.constant 0 : index
    %78 = vector.load %arg9[%c0_53, %c0_54] : memref<4x4xbf16, #tpu.memory_space<vmem>>, vector<4x4xbf16>
    %79 = arith.truncf %77 : vector<4x256xf32> to vector<4x256xbf16>
    %cst_55 = arith.constant dense<0.000000e+00> : vector<4x256xf32>
    %80 = tpu.matmul %78, %79, %cst_55 {dimension_numbers = #tpu.dot_dimension_numbers<[1], [0], [0], [1], [0, 0, 1, 1], [], []>} : vector<4x4xbf16>, vector<4x256xbf16>, vector<4x256xf32> -> vector<4x256xf32>
    %c0_56 = arith.constant 0 : index
    %c0_57 = arith.constant 0 : index
    %81 = vector.load %arg10[%c0_56, %c0_57] : memref<4x1xf32, #tpu.memory_space<vmem>>, vector<4x1xf32>
    %82 = vector.broadcast %81 : vector<4x1xf32> to vector<4x256xf32>
    %83 = arith.addf %80, %82 : vector<4x256xf32>
    %cst_58 = arith.constant 0.000000e+00 : f32
    %84 = vector.broadcast %cst_58 : f32 to vector<4x256xf32>
    %85 = arith.cmpf ogt, %83, %84 : vector<4x256xf32>
    %cst_59 = arith.constant 0.00999999977 : f32
    %86 = vector.broadcast %cst_59 : f32 to vector<4x256xf32>
    %87 = arith.mulf %86, %83 : vector<4x256xf32>
    %88 = arith.select %85, %83, %87 : vector<4x256xi1>, vector<4x256xf32>
    %c0_60 = arith.constant 0 : index
    %c0_61 = arith.constant 0 : index
    %89 = vector.load %arg11[%c0_60, %c0_61] : memref<4x4xbf16, #tpu.memory_space<vmem>>, vector<4x4xbf16>
    %90 = arith.truncf %88 : vector<4x256xf32> to vector<4x256xbf16>
    %cst_62 = arith.constant dense<0.000000e+00> : vector<4x256xf32>
    %91 = tpu.matmul %89, %90, %cst_62 {dimension_numbers = #tpu.dot_dimension_numbers<[1], [0], [0], [1], [0, 0, 1, 1], [], []>} : vector<4x4xbf16>, vector<4x256xbf16>, vector<4x256xf32> -> vector<4x256xf32>
    %c0_63 = arith.constant 0 : index
    %c0_64 = arith.constant 0 : index
    %92 = vector.load %arg12[%c0_63, %c0_64] : memref<4x1xf32, #tpu.memory_space<vmem>>, vector<4x1xf32>
    %93 = vector.broadcast %92 : vector<4x1xf32> to vector<4x256xf32>
    %94 = arith.addf %91, %93 : vector<4x256xf32>
    %c0_65 = arith.constant 0 : index
    %c0_66 = arith.constant 0 : index
    %c0_67 = arith.constant 0 : index
    %95 = vector.load %arg13[%c0_65, %c0_66, %c0_67] : memref<1x4x256xf32, #tpu.memory_space<vmem>>, vector<1x4x256xf32>
    %96 = vector.shape_cast %95 : vector<1x4x256xf32> to vector<4x256xf32>
    %97 = vector.shape_cast %94 : vector<4x256xf32> to vector<1x4x256xf32>
    tpu.vector_store %arg13[%c0_65, %c0_66, %c0_67], %97 {strides = array<i32>} : memref<1x4x256xf32, #tpu.memory_space<vmem>>, vector<1x4x256xf32>,
    return
  }
  func.func @transform_0(%arg0: i32) -> (i32, i32, i32) {
    %c0_i32 = arith.constant 0 : i32
    %c0_i32_0 = arith.constant 0 : i32
    %c0_i32_1 = arith.constant 0 : i32
    return %arg0, %c0_i32, %c0_i32_0 : i32, i32, i32
  }
  func.func @transform_1(%arg0: i32) -> (i32, i32, i32) {
    %c0_i32 = arith.constant 0 : i32
    %c0_i32_0 = arith.constant 0 : i32
    %c0_i32_1 = arith.constant 0 : i32
    return %arg0, %c0_i32, %c0_i32_0 : i32, i32, i32
  }
  func.func @transform_2(%arg0: i32) -> (i32, i32) {
    %c0_i32 = arith.constant 0 : i32
    %c0_i32_0 = arith.constant 0 : i32
    %c0_i32_1 = arith.constant 0 : i32
    return %c0_i32, %c0_i32_0 : i32, i32
  }
  func.func @transform_3(%arg0: i32) -> (i32, i32) {
    %c0_i32 = arith.constant 0 : i32
    %c0_i32_0 = arith.constant 0 : i32
    %c0_i32_1 = arith.constant 0 : i32
    return %c0_i32, %c0_i32_0 : i32, i32
  }
  func.func @transform_4(%arg0: i32) -> (i32, i32) {
    %c0_i32 = arith.constant 0 : i32
    %c0_i32_0 = arith.constant 0 : i32
    %c0_i32_1 = arith.constant 0 : i32
    return %c0_i32, %c0_i32_0 : i32, i32
  }
  func.func @transform_5(%arg0: i32) -> (i32, i32) {
    %c0_i32 = arith.constant 0 : i32
    %c0_i32_0 = arith.constant 0 : i32
    %c0_i32_1 = arith.constant 0 : i32
    return %c0_i32, %c0_i32_0 : i32, i32
  }
  func.func @transform_6(%arg0: i32) -> (i32, i32) {
    %c0_i32 = arith.constant 0 : i32
    %c0_i32_0 = arith.constant 0 : i32
    %c0_i32_1 = arith.constant 0 : i32
    return %c0_i32, %c0_i32_0 : i32, i32
  }
  func.func @transform_7(%arg0: i32) -> (i32, i32) {
    %c0_i32 = arith.constant 0 : i32
    %c0_i32_0 = arith.constant 0 : i32
    %c0_i32_1 = arith.constant 0 : i32
    return %c0_i32, %c0_i32_0 : i32, i32
  }
  func.func @transform_8(%arg0: i32) -> (i32, i32) {
    %c0_i32 = arith.constant 0 : i32
    %c0_i32_0 = arith.constant 0 : i32
    %c0_i32_1 = arith.constant 0 : i32
    return %c0_i32, %c0_i32_0 : i32, i32
  }
  func.func @transform_9(%arg0: i32) -> (i32, i32) {
    %c0_i32 = arith.constant 0 : i32
    %c0_i32_0 = arith.constant 0 : i32
    %c0_i32_1 = arith.constant 0 : i32
    return %c0_i32, %c0_i32_0 : i32, i32
  }
  func.func @transform_10(%arg0: i32) -> (i32, i32) {
    %c0_i32 = arith.constant 0 : i32
    %c0_i32_0 = arith.constant 0 : i32
    %c0_i32_1 = arith.constant 0 : i32
    return %c0_i32, %c0_i32_0 : i32, i32
  }
  func.func @transform_11(%arg0: i32) -> (i32, i32) {
    %c0_i32 = arith.constant 0 : i32
    %c0_i32_0 = arith.constant 0 : i32
    %c0_i32_1 = arith.constant 0 : i32
    return %c0_i32, %c0_i32_0 : i32, i32
  }
  func.func @transform_12(%arg0: i32) -> (i32, i32, i32) {
    %c0_i32 = arith.constant 0 : i32
    %c0_i32_0 = arith.constant 0 : i32
    %c0_i32_1 = arith.constant 0 : i32
    return %arg0, %c0_i32, %c0_i32_0 : i32, i32, i32
  }
}

</mosaic_0001>

<bundles_post_ra>
// kernel: cross_attention_forward.1
= control target key start
LH: loop header
LB: loop body
LE: loop exit
PB: predicated region body
PF: predicated region fallthrough
CT: control target
= control target key end

     0   :  { %s1128_s21 = smov 0   ;;  %s1235_s0 = inlined_call_operand.vmem [shape: f32[2,4,256], index: 0, kind: input, shape index: {}]   ;;  %s1236_s1 = inlined_call_operand.vmem [shape: f32[2,8,256], index: 1, kind: input, shape index: {}]   ;;  %s1237_s2 = inlined_call_operand.vmem [shape: bf16[16,4], index: 2, kind: input, shape index: {}]   ;;  %s1238_s3 = inlined_call_operand.vmem [shape: f32[16,1], index: 3, kind: input, shape index: {}]   ;;  %s1239_s4 = inlined_call_operand.vmem [shape: bf16[8,8], index: 4, kind: input, shape index: {}]   ;;  %s1240_s5 = inlined_call_operand.vmem [shape: f32[8,1], index: 5, kind: input, shape index: {}]   ;;  %s1241_s6 = inlined_call_operand.vmem [shape: f32[4,1], index: 6, kind: input, shape index: {}]   ;;  %s1242_s7 = inlined_call_operand.vmem [shape: f32[4,1], index: 7, kind: input, shape index: {}]   ;;  %s1243_s8 = inlined_call_operand.vmem [shape: bf16[4,4], index: 8, kind: input, shape index: {}]   ;;  %s1244_s9 = inlined_call_operand.vmem [shape: f32[4,1], index: 9, kind: input, shape index: {}]   ;;  %s1245_s10 = inlined_call_operand.vmem [shape: bf16[4,4], index: 10, kind: input, shape index: {}]   ;;  %s1246_s11 = inlined_call_operand.vmem [shape: f32[4,1], index: 11, kind: input, shape index: {}]   ;;  %s1247_s12 = inlined_call_operand.vmem [shape: f32[2,4,256], index: 12, kind: output, shape index: {}]  }
   0x1 LB: > { %s1006_s22 = sadd.s32 4294967295, %s1058_s21   ;;  %p1010_p0 = scmp.ge.s32.totalorder %s1058_s21, 1  ;;  %s1058_s21 = sphi %s1128_s21, %s22_s21  }
   0x2   : > { %p372_p1 = scmp.lt.s32.totalorder %s1058_s21, 3 }
   0x4   : > { %p373_p2 = pnand %p1010_p0, %p372_p1 }
   0x5   : > { %p419_p3 = scmp.lt.s32.totalorder (!%p373_p2), %s1006_s22, 1 }
   0x6   : > { %376 = sbr.rel (%p373_p2) target bundleno = 1493 (0x5d5), region = 68 }
   0xb   : > { %v1060_v0 = vmov 0   ;;  %s1249_s22 = smov (!%p419_p3, %s1006_s22), 1  ;;  %v519_v1 = vld [vmem:[%s1240_s5] sm:$0xff]  ;;  %vm529_vm0 = vcmask 1043456   ;;  %vm468_vm1 = vcmask 1041408   ;;  %v448_v10 = vld [vmem:[%s1238_s3 + $0x8] sm:$0xff] }
   0xc   : > { %568 = vmatprep.mubr.bf16.mxu1 %v1060_v0  ;;  %507 = vmatprep.mubr.bf16.mxu0 %v1060_v0  ;;  %s1031_s25 = sshll.u32 %s1249_s22, 4  ;;  %s1030_s26 = sshll.u32 %s1249_s22, 3  ;;  %v447_v2 = vld [vmem:[%s1238_s3] sm:$0xff]  ;;  %vm525_vm2 = vcmask 64512   ;;  %vm464_vm3 = vcmask 31744   ;;  %vm648_vm4 = vcmask 60416  }
   0xd   : > { %1044 = vset.pattern.permute.xlu0 %v1060_v0  ;;  %1045 = vset.pattern.permute.xlu1 %v1060_v0  ;;  %s428_s13 = scalar_lea.vmem %s1236_s1, %s1031_s25  ;;  %s423_s16 = scalar_lea.vmem %s1235_s0, %s1030_s26  ;;  %v518_v14 = vld [vmem:[%s1239_s4] sm:$0xf]  ;;  %vm713_vm5 = vcmask 516096   ;;  %vm721_vm6 = vcmask 1040896  }
   0xe   : > { %522 = vperm.xlu0 %1044, %v519_v1   ;;  %v442_v3 = vld [vmem:[%s428_s13 + $0x8] sm:$0xff]  ;;  %v441_v4 = vld [vmem:[%s428_s13] sm:$0xff]  ;;  %s1061_s25 = smov 64  }
   0xf   : > { %v435_v5 = vld [vmem:[%s423_s16] sm:$0xff]  ;;  %v444_v6 = vpack.c.bf16 %v442_v3, %v442_v3  ;;  %v443_v7 = vpack.c.bf16 %v441_v4, %v441_v4 }
  0x10   : > { %v437_v8 = vcombine.high %v435_v5, %v435_v5  ;;  %v439_v9 = vpack.c.bf16 %v435_v5, %v435_v5  ;;  %v1047_v15 = vld [vmem:[%s1237_s2] sm:$0xff]  }
  0x11   : > { %1020 = vmatprep.subr.msk.bf16.mxu1 %vm529_vm0, %v444_v6  ;;  %v531_v11 = vsel %vm529_vm0, %v443_v7, 0  ;;  %v790_v63 = vld [vmem:[%s1242_s7] sm:$0xf] }
  0x12   : > { %451 = vperm.xlu0 %1044, %v447_v2   ;;  %v440_v12 = vpack.c.bf16 %v437_v8, %v437_v8  ;;  %v470_v13 = vsel %vm468_vm1, %v439_v9, 0  ;;  %551 = vmatpush1.bf16.msra.mxu1 %v531_v11  ;;  %v878_v1 = vld [vmem:[%s1246_s11] sm:$0xf] }
  0x13   : > { %v776_v3 = vld [vmem:[%s1241_s6] sm:$0xf] }
  0x14   : > { %1018 = vmatprep.subr.msk.bf16.mxu0 %vm468_vm1, %v440_v12  ;;  %v813_v4 = vld [vmem:[%s1244_s9] sm:$0xf] }
  0x15   : > { %490 = vmatpush1.bf16.msra.mxu0 %v470_v13  ;;  %1021 = vmatmul.mubr.msk.bf16.vlgmr.msra.gmra.mxu1 %vm525_vm2, %v518_v14  ;;  %v1062_v13 = vmov 839922192  }
  0x16   : > { %456 = vperm.xlu0 %1044, %v448_v10   ;;  %704 = vmatprep.mubr.bf16.mxu1 %v1060_v0  ;;  %v782_v14 = vunpack.c.l.s4 %v1062_v13 }
  0x18   : > { %1019 = vmatmul.mubr.msk.bf16.vlgmr.msra.gmra.mxu0 %vm464_vm3, %v1047_v15  ;;  %v784_v15 = vlaneseq }
  0x89   : > { %v523_v16 = vpop.permute.xlu0 %522 }
  0x8d   : > { %v452_v17 = vpop.permute.xlu0 %451 }
  0x91   : > { %v457_v25 = vpop.permute.xlu0 %456 }
  0xd5   : > { %v570_v18 = vpop.f32.mrf.mxu1 }
  0xd6   : > { %v571_v22 = vadd.f32 %v570_v18, %v523_v16 }
  0xd7   : > { %v572_v20 = vpop.f32.mrf.mxu1 }
  0xd8   : > { %v509_v19 = vpop.f32.mrf.mxu0  ;;  %v573_v21 = vadd.f32 %v572_v20, %v523_v16  ;;  %v783_v16 = vunpack.c.0.s8 %v782_v14 }
  0xd9   : > { %v574_v24 = vpop.f32.mrf.mxu1  ;;  %v510_v29 = vadd.f32 %v509_v19, %v452_v17 }
  0xda   : > { %v511_v23 = vpop.f32.mrf.mxu0  ;;  %607 = vmatprep.subr.mxu0 %v573_v21 }
  0xdb   : > { %v512_v26 = vadd.f32 %v511_v23, %v452_v17  ;;  %v575_v28 = vpop.f32.mrf.mxu1  ;;  %608 = vmatpush1.xpose.msra.mxu0 %v571_v22  ;;  %v785_v17 = vshrl.u32 %v784_v15, 7 }
  0xdc   : > { %v513_v27 = vpop.f32.mrf.mxu0 }
  0xdd   : > { %v514_v30 = vadd.f32 %v513_v27, %v457_v25  ;;  %641 = vmatprep.mubr.f32.mxu0 %v512_v26  ;;  %v786_v18 = vsub.s32 %v783_v16, %v785_v17 }
  0xde   : > { %v515_v31 = vpop.f32.mrf.mxu0  ;;  %642 = vmatmul.mubr.f32.vlgmr.msra.gmra.mxu0 %v510_v29 }
  0xdf   : > { %v661_v32 = vpack.c.bf16 %v514_v30, %v514_v30  ;;  %v516_v33 = vadd.f32 %v515_v31, %v457_v25  ;;  %860 = vmatprep.mubr.bf16.mxu0 %v1060_v0 }
  0xe1   : > { %v662_v34 = vpack.c.bf16 %v516_v33, %v516_v33  ;;  %v667_v35 = vsel %vm529_vm0, %v661_v32, 0  ;;  %v807_v32 = vld [vmem:[%s1243_s8] sm:$0x3] }
  0xe3   : > { %1022 = vmatprep.subr.msk.bf16.mxu1 %vm529_vm0, %v662_v34 }
  0xe4   : > { %687 = vmatpush1.bf16.msra.mxu1 %v667_v35 }
 0x19e   : > { %v643_v36 = vpop.f32.mrf.mxu0 }
 0x19f   : > { %v647_v37 = vmul.f32 0.0625, %v643_v36 }
 0x1a0   : > { %v645_v38 = vpop.f32.mrf.mxu0 }
 0x1a1   : > { %v649_v39 = vsel %vm648_vm4, %v647_v37, -inf }
 0x1a2   : > { %650 = vmax.xlane.f32.xlu1 %v649_v39 }
 0x22b   : > { %v651_v40 = vpop.xlane.xlu1 %650 }
 0x22c   : > { %v652_v41 = vsub.f32 %v647_v37, %v651_v40 }
 0x22e   : > { %v653_v42 = vmul.f32 1.442695, %v652_v41 }
 0x230   : > { %1048 = vpow2.f32 %v653_v42 }
 0x23d   : > { %v1049_v43 = vpop.eup %1048 }
 0x23e   : > { %v655_v44 = vsel %vm648_vm4, %v1049_v43, 0.0 }
 0x23f   : > { %656 = vadd.xlane.f32.xlu1 %v655_v44 }
 0x2c8   : > { %v657_v45 = vpop.xlane.xlu1 %656 }
 0x2c9   : > { %1050 = vrcp.f32 %v657_v45 }
 0x2d6   : > { %v1051_v46 = vpop.eup %1050 }
 0x2d7   : > { %v659_v47 = vmul.f32 %v1051_v46, %v1049_v43 }
 0x2d9   : > { %v660_v48 = vpack.c.bf16 %v659_v47, %v659_v47  ;;  %v875_v47 = vld [vmem:[%s1245_s10] sm:$0x3] }
 0x2db   : > { %1023 = vmatmul.mubr.msk.bf16.vlgmr.msra.gmra.mxu1 %vm525_vm2, %v660_v48 }
 0x2dc   : > { %925 = vmatprep.mubr.bf16.mxu1 %v1060_v0 }
 0x39b   : > { %v706_v49 = vpop.f32.mrf.mxu1 }
 0x39c   : > { %733 = vrot.lane.b32.xlu1 %v706_v49, %s1061_s25  ;;  %v727_v50 = vrot.slane %v706_v49, 7  ;;  %v723_v51 = vrot.slane %v706_v49, 6  ;;  %714 = vst.msk [vmem:[#allocation2] sm:$0x1] %vm713_vm5, %v706_v49  ;;  %v716_v58 = vrot.slane %v706_v49, 5 }
 0x39d   : > { %v708_v52 = vpop.f32.mrf.mxu1 }
 0x39e   : > { %763 = vrot.lane.b32.xlu0 %v708_v52, %s1061_s25  ;;  %v728_v53 = vrot.slane %v727_v50, 4  ;;  %v724_v54 = vrot.slane %v723_v51, 4  ;;  %v757_v55 = vrot.slane %v708_v52, 7  ;;  %745 = vst.msk [vmem:[#allocation2 + $0x2] sm:$0x1] %vm713_vm5, %v708_v52  ;;  %v753_v57 = vrot.slane %v708_v52, 6 }
 0x39f   : > { %v710_v56 = vpop.f32.mrf.mxu1  ;;  %v717_v62 = vrot.slane %v716_v58, 4  ;;  %v747_v0 = vrot.slane %v708_v52, 5 }
 0x3a0   : > { %729 = vrot.lane.b32.xlu1 %v728_v53, %s1061_s25  ;;  %726 = vst.msk [vmem:[#allocation2 + $0x4] sm:$0x1] %vm713_vm5, %v724_v54  ;;  %v754_v60 = vrot.slane %v753_v57, 4  ;;  %v758_v61 = vrot.slane %v757_v55, 4 }
 0x3a1   : > { %v711_v59 = vpop.f32.mrf.mxu1  ;;  %v748_v2 = vrot.slane %v747_v0, 4 }
 0x3a2   : > { %739 = vrot.lane.b32.xlu0 %v724_v54, %s1061_s25  ;;  %756 = vst.msk [vmem:[#allocation2 + $0x6] sm:$0x1] %vm713_vm5, %v754_v60 }
 0x3a4   : > { %759 = vrot.lane.b32.xlu1 %v758_v61, %s1061_s25 }
 0x3a6   : > { %718 = vrot.lane.b32.xlu0 %v717_v62, %s1061_s25 }
 0x3a8   : > { %793 = vperm.xlu1 %1045, %v790_v63  }
 0x3aa   : > { %769 = vrot.lane.b32.xlu0 %v754_v60, %s1061_s25 }
 0x3ac   : > { %881 = vperm.xlu1 %1045, %v878_v1  }
 0x3ae   : > { %749 = vrot.lane.b32.xlu0 %v748_v2, %s1061_s25  ;;  %s433_s25 = scalar_lea.vmem %s1247_s12, %s1030_s26 }
 0x3b2   : > { %779 = vperm.xlu0 %1044, %v776_v3  }
 0x3b6   : > { %816 = vperm.xlu0 %1044, %v813_v4  }
 0x40e   : > { %v734_v5 = vpop.permute.xlu1 %733 }
 0x40f   : > { %736 = vst.msk [vmem:[#allocation2 + $0x1] sm:$0x1] %vm713_vm5, %v734_v5 }
 0x410   : > { %738 = vst.msk [vmem:[#allocation2 + $0x1] sm:$0x1] %vm721_vm6, %v717_v62  ;;  %v764_v6 = vpop.permute.xlu0 %763 }
 0x411   : > { %766 = vst.msk [vmem:[#allocation2 + $0x3] sm:$0x1] %vm713_vm5, %v764_v6 }
 0x412   : > { %768 = vst.msk [vmem:[#allocation2 + $0x3] sm:$0x1] %vm721_vm6, %v748_v2  ;;  %v730_v7 = vpop.permute.xlu1 %729 }
 0x413   : > { %732 = vst.msk [vmem:[#allocation2 + $0x4] sm:$0x1] %vm721_vm6, %v730_v7 }
 0x414   : > { %v740_v8 = vpop.permute.xlu0 %739 }
 0x415   : > { %742 = vst.msk [vmem:[#allocation2 + $0x5] sm:$0x1] %vm713_vm5, %v740_v8 }
 0x416   : > { %744 = vst.msk [vmem:[#allocation2 + $0x5] sm:$0x1] %vm721_vm6, %v728_v53  ;;  %v760_v9 = vpop.permute.xlu1 %759 }
 0x417   : > { %762 = vst.msk [vmem:[#allocation2 + $0x6] sm:$0x1] %vm721_vm6, %v760_v9 }
 0x418   : > { %v719_v10 = vpop.permute.xlu0 %718 }
 0x419   : > { %722 = vst.msk [vmem:[#allocation2] sm:$0x1] %vm721_vm6, %v719_v10 }
 0x41c   : > { %v770_v11 = vpop.permute.xlu0 %769 }
 0x41d   : > { %772 = vst.msk [vmem:[#allocation2 + $0x7] sm:$0x1] %vm713_vm5, %v770_v11 }
 0x41e   : > { %774 = vst.msk [vmem:[#allocation2 + $0x7] sm:$0x1] %vm721_vm6, %v758_v61 }
 0x420   : > { %v750_v12 = vpop.permute.xlu0 %749 }
 0x421   : > { %752 = vst.msk [vmem:[#allocation2 + $0x2] sm:$0x1] %vm721_vm6, %v750_v12 }
 0x423   : > { %v794_v19 = vpop.permute.xlu1 %793 }
 0x424   : > { %v801_v21 = vrot.slane %v794_v19, %v786_v18 }
 0x427   : > { %v882_v49 = vpop.permute.xlu1 %881 }
 0x428   : > { %v775_v23 = vld [vmem:[#allocation2] sm:$0xff] }
 0x42d   : > { %v780_v20 = vpop.permute.xlu0 %779 }
 0x42e   : > { %v787_v22 = vrot.slane %v780_v20, %v786_v18 }
 0x430   : > { %v789_v24 = vmul.f32 %v787_v22, %v775_v23 }
 0x431   : > { %v817_v33 = vpop.permute.xlu0 %816 }
 0x432   : > { %v803_v25 = vadd.f32 %v801_v21, %v789_v24 }
 0x434   : > { %vm804_vm7 = vcmp.gt.f32.partialorder %v803_v25, 0.0  ;;  %v805_v26 = vmul.f32 0.01, %v803_v25 }
 0x436   : > { %v806_v27 = vsel %vm804_vm7, %v803_v25, %v805_v26 }
 0x437   : > { %v809_v28 = vcombine.high %v806_v27, %v806_v27  ;;  %v811_v29 = vpack.c.bf16 %v806_v27, %v806_v27 }
 0x439   : > { %v812_v30 = vpack.c.bf16 %v809_v28, %v809_v28  ;;  %v823_v31 = vsel %vm468_vm1, %v811_v29, 0 }
 0x43b   : > { %1024 = vmatprep.subr.msk.bf16.mxu0 %vm468_vm1, %v812_v30 }
 0x43c   : > { %843 = vmatpush1.bf16.msra.mxu0 %v823_v31 }
 0x43f   : > { %1025 = vmatmul.mubr.msk.bf16.vlgmr.msra.gmra.mxu0 %vm464_vm3, %v807_v32 }
 0x4ff   : > { %v862_v34 = vpop.f32.mrf.mxu0 }
 0x500   : > { %v863_v35 = vadd.f32 %v862_v34, %v817_v33 }
 0x501   : > { %v864_v36 = vpop.f32.mrf.mxu0 }
 0x502   : > { %vm869_vm8 = vcmp.gt.f32.partialorder %v863_v35, 0.0  ;;  %v871_v37 = vmul.f32 0.01, %v863_v35  ;;  %v865_v38 = vadd.f32 %v864_v36, %v817_v33 }
 0x503   : > { %v866_v39 = vpop.f32.mrf.mxu0 }
 0x504   : > { %v873_v40 = vsel %vm869_vm8, %v863_v35, %v871_v37  ;;  %vm870_vm9 = vcmp.gt.f32.partialorder %v865_v38, 0.0  ;;  %v872_v41 = vmul.f32 0.01, %v865_v38 }
 0x505   : > { %v876_v42 = vpack.c.bf16 %v873_v40, %v873_v40  ;;  %v867_v43 = vpop.f32.mrf.mxu0 }
 0x506   : > { %v874_v44 = vsel %vm870_vm9, %v865_v38, %v872_v41 }
 0x507   : > { %v877_v45 = vpack.c.bf16 %v874_v44, %v874_v44  ;;  %v888_v46 = vsel %vm468_vm1, %v876_v42, 0 }
 0x509   : > { %1026 = vmatprep.subr.msk.bf16.mxu1 %vm468_vm1, %v877_v45 }
 0x50a   : > { %908 = vmatpush1.bf16.msra.mxu1 %v888_v46 }
 0x50d   : > { %1027 = vmatmul.mubr.msk.bf16.vlgmr.msra.gmra.mxu1 %vm464_vm3, %v875_v47 }
 0x5cd   : > { %v927_v48 = vpop.f32.mrf.mxu1 }
 0x5ce   : > { %v928_v51 = vadd.f32 %v927_v48, %v882_v49 }
 0x5cf   : > { %v929_v50 = vpop.f32.mrf.mxu1 }
 0x5d0   : > { %v930_v52 = vadd.f32 %v929_v50, %v882_v49 }
 0x5d1   : > { %v931_v53 = vpop.f32.mrf.mxu1 }
 0x5d2   : > { %v936_v54 = vcombine.low %v928_v51, %v930_v52 }
 0x5d3   : > { %v932_v55 = vpop.f32.mrf.mxu1 }
 0x5d4   : > { %938 = vst [vmem:[%s433_s25] sm:$0xff] %v936_v54 }
 0x5d5 PF: > { %s22_s21 = sadd.s32 1, %s1058_s21  }
 0x5d6   : > { %p19_p4 = scmp.ge.s32.totalorder %s22_s21, 4  }
 0x5d8   :  { %21 = sbr.rel (!%p19_p4) target bundleno = 1 (0x1), region = 101 }

</bundles_post_ra>
